<compile_context>
chip_gen: v5e
topology: v5e:2x2
jax: 0.10.0
libtpu: 0.0.40
codegen_flags: <defaults>
</compile_context>

<pallas_src>
import math

import jax
import jax.numpy as jnp
from jax.experimental import pallas as pl
from jax.experimental.pallas import tpu as pltpu


_SUBLANE = 8
_MXU = 256


def _round_up(x, m):
    return (x + m - 1) // m * m


def _vmem_budget_bytes():
    """~75% of this generation's per-core VMEM (v5e/v6e: 128 MiB, v7x: 64 MiB)."""
    try:
        cap = getattr(pltpu.get_tpu_info(), "vmem_capacity_bytes", 64 << 20)
    except Exception:
        cap = 64 << 20
    return int(0.75 * cap)


def _sll_linear_kernel(x_ref, wt_ref, tw_ref, bias_ref, o_ref):
    """Fused SLL linear forward for one row tile.

    x_ref   : (tm, cin)   input rows, caller dtype
    wt_ref  : (cin, cout) bf16  == W^T
    tw_ref  : (cout, cin) bf16  == diag(T) @ W   (T folded into W on the host)
    bias_ref: (1, cout)   f32
    o_ref   : (tm, cin)   output rows, caller dtype
    """
    x = x_ref[...]
    # h = ReLU(x @ W^T + b)          (MXU matmul in bf16, f32 accumulate)
    h = jnp.dot(x.astype(jnp.bfloat16), wt_ref[...],
                preferred_element_type=jnp.float32)
    h = jnp.maximum(h + bias_ref[...], 0.0)
    # res = h @ (diag(T) W)          (second MXU matmul, T pre-folded)
    res = jnp.dot(h.astype(jnp.bfloat16), tw_ref[...],
                  preferred_element_type=jnp.float32)
    o_ref[...] = (x.astype(jnp.float32) - res).astype(o_ref.dtype)


def get_rescaling(weights, q, epsilon=1e-6):
    # Parameter-only setup (cout x cout); tiny, kept in plain JAX (glue).
    q_abs = jnp.abs(q)
    q_row = q_abs[None, :]
    q_inv = (1.0 / (q_abs + epsilon))[:, None]
    t = 2.0 / (jnp.abs(q_inv * (weights @ weights.T) * q_row).sum(axis=1)
               + epsilon)
    return t


def sll_linear_forward(x, weights, bias, q, epsilon=1e-6, block_m=None):
    """SLLLinear.forward. x may have arbitrary leading dims; last dim = cin."""
    cout, cin = weights.shape
    orig_shape = x.shape
    assert orig_shape[-1] == cin

    # Keep the caller's activation dtype for the x / out DMAs.
    x_dtype = x.dtype
    x_itemsize = jnp.dtype(x_dtype).itemsize
    x2 = x.reshape(-1, cin)
    M = x2.shape[0]

    # Host-side parameter prep: rescaling T folded into the second matmul's W.
    w_f32 = weights.astype(jnp.float32)
    t = get_rescaling(w_f32, q.astype(jnp.float32), epsilon)       # (cout,)
    wt_bf = w_f32.T.astype(jnp.bfloat16)                           # (cin, cout)
    tw_bf = (t[:, None] * w_f32).astype(jnp.bfloat16)              # (cout, cin)
    bias2 = bias.reshape(1, cout).astype(jnp.float32)

    # ---- row-tile choice ---------------------------------------------------
    vmem_cap = _vmem_budget_bytes()
    if block_m is None:
        block_m = 1024 if cin <= 256 else 512   # HBM-bound: big row tiles

    weight_bytes = 2 * cin * cout * 2 + cout * 4     # resident, single-buffered
    headroom = 4 << 20
    # per-row VMEM cost: x/out double buffers + f32/bf16 intermediates
    per_row = 4 * cin * x_itemsize + 6 * cout + 4 * cin
    tm_vmem = max(_SUBLANE, (vmem_cap - weight_bytes - headroom) // per_row)

    tm = min(block_m, int(tm_vmem), _round_up(M, _SUBLANE))
    # v7x has 2 TensorCores: make sure the "parallel" grid has >= 2 steps.
    if M > _SUBLANE:
        tm = min(tm, _round_up(-(-M // 2), _SUBLANE))
    # Align to the 256x256 MXU when the tile is large enough, else sublane.
    if tm >= _MXU:
        tm = (tm // _MXU) * _MXU
    else:
        tm = _round_up(tm, _SUBLANE)

    Mp = _round_up(M, tm)
    if Mp != M:
        x2 = jnp.pad(x2, ((0, Mp - M), (0, 0)))
    grid = (Mp // tm,)

    # TODO(synk): for layers where the resident W^T / diag(T)W pair approaches
    # the VMEM budget (mostly v7x, 64 MiB/TC), add a cout-reduction grid axis
    # with an f32 accumulator (or fp8 weights on v7x) instead of full residency.

    # x in_spec: default double-buffering; deepen when tiles are tiny and the
    # grid is long enough that per-step DMA latency would otherwise be exposed.
    if tm < 128 and grid[0] >= 3:
        x_in_spec = pl.BlockSpec((tm, cin), lambda i: (i, 0),
                                 pipeline_mode=pl.Buffered(3))
    else:
        x_in_spec = pl.BlockSpec((tm, cin), lambda i: (i, 0))

    vmem_needed = (weight_bytes
                   + 2 * 2 * tm * cin * x_itemsize       # x + out double-buffers
                   + tm * cout * 6 + tm * cin * 4        # intermediates
                   + headroom)
    vmem_limit = int(min(max(vmem_needed, 8 << 20), vmem_cap))

    cost = pl.CostEstimate(
        flops=2 * 2 * Mp * cin * cout,                   # two matmuls
        transcendentals=0,
        bytes_accessed=(2 * Mp * cin * x_itemsize        # x in + out
                        + 2 * cin * cout * 2             # W^T and diag(T)W
                        + cout * 4))                     # bias

    out = pl.pallas_call(
        _sll_linear_kernel,
        out_shape=jax.ShapeDtypeStruct((Mp, cin), x_dtype),
        grid_spec=pltpu.PrefetchScalarGridSpec(
            num_scalar_prefetch=0,
            grid=grid,
            in_specs=[
                x_in_spec,
                # Constant-index operands stay resident: single-buffer them.
                pl.BlockSpec((cin, cout), lambda i: (0, 0),
                             pipeline_mode=pl.Buffered(1)),
                pl.BlockSpec((cout, cin), lambda i: (0, 0),
                             pipeline_mode=pl.Buffered(1)),
                pl.BlockSpec((1, cout), lambda i: (0, 0),
                             pipeline_mode=pl.Buffered(1)),
            ],
            out_specs=pl.BlockSpec((tm, cin), lambda i: (i, 0)),
        ),
        compiler_params=pltpu.CompilerParams(
            dimension_semantics=("parallel",),
            vmem_limit_bytes=vmem_limit),
        cost_estimate=cost,
    )(x2, wt_bf, tw_bf, bias2)

    return out[:M].reshape(orig_shape)


def sll_linear_reference(x, weights, bias, q, epsilon=1e-6):
    """Pure-JAX f32 reference (mirrors the PyTorch forward exactly)."""
    res = x @ weights.T + bias
    res = jnp.maximum(res, 0.0)
    t = get_rescaling(weights, q, epsilon)
    res = t * res
    res = res @ weights
    return x - res


def sll_linear_reference_bf16(x, weights, bias, q, epsilon=1e-6):
    """Reference matching the kernel's bf16-MXU / f32-accumulate numerics."""
    cout, cin = weights.shape
    w_f32 = weights.astype(jnp.float32)
    t = get_rescaling(w_f32, q.astype(jnp.float32), epsilon)
    x2 = x.reshape(-1, cin)
    h = jnp.dot(x2.astype(jnp.bfloat16), w_f32.T.astype(jnp.bfloat16),
                preferred_element_type=jnp.float32)
    h = jnp.maximum(h + bias[None, :].astype(jnp.float32), 0.0)
    res = jnp.dot(h.astype(jnp.bfloat16),
                  (t[:, None] * w_f32).astype(jnp.bfloat16),
                  preferred_element_type=jnp.float32)
    out = x2.astype(jnp.float32) - res
    return out.astype(x.dtype).reshape(x.shape)


if __name__ == "__main__":
    # Deterministic parameter init mirroring the PyTorch __init__.
    cin, cout = 128, 256          # lane-dense (multiples of 128)
    batch, seq = 2, 8             # x: (batch, seq, cin) -> M = 16 rows

    key = jax.random.PRNGKey(0)
    k_w, k_b, k_q, k_x = jax.random.split(key, 4)

    xavier_std = math.sqrt(2.0 / (cin + cout))
    weights = xavier_std * jax.random.normal(k_w, (cout, cin), jnp.float32)
    bound = 1.0 / math.sqrt(cin)
    bias = jax.random.uniform(k_b, (cout,), jnp.float32, -bound, bound)
    q = jax.random.uniform(k_q, (cout,), jnp.float32)   # torch.rand(cout)

    x = jax.random.normal(k_x, (batch, seq, cin), jnp.float32)

    # Default block_m; the >=2-grid-step cap yields a 2-tile pipelined grid.
    out = sll_linear_forward(x, weights, bias, q)
    out = jax.block_until_ready(out)
    assert out.shape == x.shape
    assert out.dtype == x.dtype

    # Tight check vs a reference using identical bf16-MXU / f32-acc numerics.
    ref_bf16 = sll_linear_reference_bf16(x, weights, bias, q)
    assert jnp.allclose(out, ref_bf16, atol=1e-3, rtol=1e-3), \
        "mismatch vs bf16-matched reference"

    # Semantics check vs the full-f32 PyTorch-equivalent forward
    # (tolerance accounts for bf16 matmul operands).
    ref = sll_linear_reference(x, weights, bias, q)
    assert jnp.allclose(out, ref, atol=2e-2, rtol=2e-2), \
        "mismatch vs f32 reference"

    print("KERNEL_OK")
</pallas_src>

<mosaic_0001>
module attributes {stable_mosaic.version = 11 : i64} {
  func.func @_sll_linear_kernel(%arg0: i32, %arg1: memref<8x128xf32, #tpu.memory_space<vmem>>, %arg2: memref<128x256xbf16, #tpu.memory_space<vmem>>, %arg3: memref<256x128xbf16, #tpu.memory_space<vmem>>, %arg4: memref<1x256xf32, #tpu.memory_space<vmem>>, %arg5: memref<8x128xf32, #tpu.memory_space<vmem>>) attributes {dimension_semantics = [#tpu.dimension_semantics<parallel>], iteration_bounds = array<i64: 2>, scalar_prefetch = 0 : i64, scratch_operands = 0 : i64, tpu.core_type = #tpu.core_type<tc>, window_params = [{transform_indices = @transform_0, window_bounds = array<i64: 8, 128>}, {pipeline_mode = #tpu.pipeline_mode<synchronous>, transform_indices = @transform_1, window_bounds = array<i64: 128, 256>}, {pipeline_mode = #tpu.pipeline_mode<synchronous>, transform_indices = @transform_2, window_bounds = array<i64: 256, 128>}, {pipeline_mode = #tpu.pipeline_mode<synchronous>, transform_indices = @transform_3, window_bounds = array<i64: 1, 256>}, {transform_indices = @transform_4, window_bounds = array<i64: 8, 128>}]} {
    %c0 = arith.constant 0 : index
    %c0_0 = arith.constant 0 : index
    %0 = vector.load %arg1[%c0, %c0_0] : memref<8x128xf32, #tpu.memory_space<vmem>>, vector<8x128xf32>
    %1 = arith.truncf %0 : vector<8x128xf32> to vector<8x128xbf16>
    %c0_1 = arith.constant 0 : index
    %c0_2 = arith.constant 0 : index
    %2 = vector.load %arg2[%c0_1, %c0_2] : memref<128x256xbf16, #tpu.memory_space<vmem>>, vector<128x256xbf16>
    %cst = arith.constant dense<0.000000e+00> : vector<8x256xf32>
    %3 = tpu.matmul %1, %2, %cst {dimension_numbers = #tpu.dot_dimension_numbers<[1], [0], [0], [1], [0, 0, 1, 1], [], []>} : vector<8x128xbf16>, vector<128x256xbf16>, vector<8x256xf32> -> vector<8x256xf32>
    %c0_3 = arith.constant 0 : index
    %c0_4 = arith.constant 0 : index
    %4 = vector.load %arg4[%c0_3, %c0_4] : memref<1x256xf32, #tpu.memory_space<vmem>>, vector<1x256xf32>
    %5 = vector.broadcast %4 : vector<1x256xf32> to vector<8x256xf32>
    %6 = arith.addf %3, %5 : vector<8x256xf32>
    %cst_5 = arith.constant 0.000000e+00 : f32
    %7 = vector.broadcast %cst_5 : f32 to vector<8x256xf32>
    %8 = arith.maximumf %6, %7 : vector<8x256xf32>
    %9 = arith.truncf %8 : vector<8x256xf32> to vector<8x256xbf16>
    %c0_6 = arith.constant 0 : index
    %c0_7 = arith.constant 0 : index
    %10 = vector.load %arg3[%c0_6, %c0_7] : memref<256x128xbf16, #tpu.memory_space<vmem>>, vector<256x128xbf16>
    %cst_8 = arith.constant dense<0.000000e+00> : vector<8x128xf32>
    %11 = tpu.matmul %9, %10, %cst_8 {dimension_numbers = #tpu.dot_dimension_numbers<[1], [0], [0], [1], [0, 0, 1, 1], [], []>} : vector<8x256xbf16>, vector<256x128xbf16>, vector<8x128xf32> -> vector<8x128xf32>
    %12 = arith.subf %0, %11 : vector<8x128xf32>
    %c0_9 = arith.constant 0 : index
    %c0_10 = arith.constant 0 : index
    %13 = vector.load %arg5[%c0_9, %c0_10] : memref<8x128xf32, #tpu.memory_space<vmem>>, vector<8x128xf32>
    tpu.vector_store %arg5[%c0_9, %c0_10], %12 {strides = array<i32>} : memref<8x128xf32, #tpu.memory_space<vmem>>, vector<8x128xf32>,
    return
  }
  func.func @transform_0(%arg0: i32) -> (i32, i32) {
    %c0_i32 = arith.constant 0 : i32
    %c0_i32_0 = arith.constant 0 : i32
    return %arg0, %c0_i32 : i32, i32
  }
  func.func @transform_1(%arg0: i32) -> (i32, i32) {
    %c0_i32 = arith.constant 0 : i32
    %c0_i32_0 = arith.constant 0 : i32
    %c0_i32_1 = arith.constant 0 : i32
    return %c0_i32, %c0_i32_0 : i32, i32
  }
  func.func @transform_2(%arg0: i32) -> (i32, i32) {
    %c0_i32 = arith.constant 0 : i32
    %c0_i32_0 = arith.constant 0 : i32
    %c0_i32_1 = arith.constant 0 : i32
    return %c0_i32, %c0_i32_0 : i32, i32
  }
  func.func @transform_3(%arg0: i32) -> (i32, i32) {
    %c0_i32 = arith.constant 0 : i32
    %c0_i32_0 = arith.constant 0 : i32
    %c0_i32_1 = arith.constant 0 : i32
    return %c0_i32, %c0_i32_0 : i32, i32
  }
  func.func @transform_4(%arg0: i32) -> (i32, i32) {
    %c0_i32 = arith.constant 0 : i32
    %c0_i32_0 = arith.constant 0 : i32
    return %arg0, %c0_i32 : i32, i32
  }
}

</mosaic_0001>

<bundles_post_ra>
// kernel: tpu_custom_call.1
= control target key start
LH: loop header
LB: loop body
LE: loop exit
PB: predicated region body
PF: predicated region fallthrough
CT: control target
= control target key end

     0   :  { %9 = vsyncpa [#allocation3], 0  ;;  %s1238_s0 = inlined_call_operand.hbm [shape: f32[16,128], index: 0, kind: input, shape index: {}]   ;;  %s1239_s1 = inlined_call_operand.hbm [shape: bf16[128,256], index: 1, kind: input, shape index: {}]   ;;  %s1240_s2 = inlined_call_operand.hbm [shape: bf16[256,128], index: 2, kind: input, shape index: {}]   ;;  %s1241_s3 = inlined_call_operand.vmem [shape: f32[1,256], index: 3, kind: input, shape index: {}]   ;;  %s1242_s4 = inlined_call_operand.hbm [shape: f32[16,128], index: 4, kind: output, shape index: {}]  }
   0x1   :  { %11 = vsyncpa [#allocation3 + $0x1], 0 }
   0x2   :  { %12 = vsyncpa [#allocation6], 0 }
   0x3   :  { %13 = vsyncpa [#allocation4], 0 }
   0x4   :  { %15 = vsyncpa [#allocation4 + $0x1], 0  ;;  %s1083_s15 = smov 0   ;;  %s1085_s16 = smov 0  }
   0x5   :  { %s1087_s17 = smov 0   ;;  %s1089_s18 = smov 0  }
   0x6 LB: > { %s152_s21 = sshll.u32 %s1239_s1, 4  ;;  %s1107_s22 = sadd.s32 4294967295, %s1050_s18   ;;  %s1050_s18 = sphi %s1089_s18, %s1253_s18   ;;  %s1046_s17 = sphi %s1087_s17, %s1252_s17   ;;  %s1042_s16 = sphi %s1085_s16, %s1251_s16   ;;  %s1038_s15 = sphi %s1083_s15, %s1250_s15   ;;  %s153_s21 = int_to_ptr.hbm [resolvable:$true] %s152_s21 }
   0x7   : > { %p644_p0 = scmp.ge.s32.totalorder %s1050_s18, 1  ;;  %p42_p1 = scmp.eq.s32.totalorder %s1107_s22, 0 }
   0x8   : > { %p141_p2 = scmp.lt.s32.totalorder %s1050_s18, 3  ;;  %s1052_s24 = smov [#allocation5]  }
   0x9   : > { %s154_s25 = sshll.u32 %s1052_s24, 4  ;;  %s166_s28 = sshll.u32 %s1240_s2, 4  ;;  %s155_s25 = int_to_ptr.vmem [resolvable:$true] %s154_s25  ;;  %s167_s28 = int_to_ptr.hbm [resolvable:$true] %s166_s28 }
   0xa   : > { %p1112_p3 = pnand %p644_p0, %p141_p2  ;;  %s1053_s29 = smov [#allocation7]  }
   0xb   : > { %s168_s30 = sshll.u32 %s1053_s29, 4  ;;  %s1054_s5 = smov 128   ;;  %s169_s30 = int_to_ptr.vmem [resolvable:$true] %s168_s30 }
   0xc   : > { %p831_p4 = pneg %p1112_p3  ;;  %s1055_s6 = smov 8  }
   0xd   : > { %s1056_s7 = smov 64   ;;  %s1057_s8 = smov 4  }
   0xe   : > { %p832_p6 = pnand %p831_p4, %p42_p1  ;;  %s643_s9 = sadd.s32 4294967294, %s1050_s18  }
   0xf   : > { %s1126_s10 = sadd.s32 1, %s1050_s18   ;;  %s28_s12 = sadd.s32 1, %s1046_s17 }
  0x10   : > { %834 = dma.hbm_to_vmem [thread:$0]  (!%p832_p6), %s153_s21, 2048, %s155_s25, [#allocation6], %s1054_s5, %s1054_s5, %s1055_s6  }
  0x11   : > { %837 = dma.hbm_to_vmem [thread:$0]  (!%p832_p6), %s167_s28, 2048, %s169_s30, [#allocation6], %s1056_s7, %s1056_s7, %s1057_s8  }
  0x12   : > { %s25_s11 = ssub.s32 %s1050_s18, %s1126_s10  ;;  %p35_p8 = scmp.ne.s32.totalorder %s1046_s17, %s1042_s16 }
  0x13   : > { %p26_p7 = scmp.eq.s32.totalorder %s25_s11, 0  ;;  %p36_p9 = scmp.eq.s32.totalorder %s1050_s18, 0 }
  0x14   : > { %p41_p10 = scmp.ne.s32.totalorder %s1042_s16, %s1038_s15  ;;  %p128_p13 = scmp.eq.s32.totalorder %s1107_s22, 1 }
  0x15   : > { %s1137_s13 = scalar_select %p26_p7, %s1046_s17, %s28_s12  }
  0x16   : > { %p1139_p11 = por %p36_p9, %p35_p8  ;;  %p1145_p12 = por %p42_p1, %p41_p10 }
  0x17   : > { %p134_p0 = scmp.eq.s32.totalorder %s643_s9, 1  ;;  %p848_p2 = scmp.lt.s32.totalorder %s1050_s18, 2 }
  0x18   : > { %s185_s20 = sand.u32 1, %s1046_s17   ;;  %p1152_p4 = por %p128_p13, %p35_p8 }
  0x19   : > { %p1156_p6 = por %p134_p0, %p41_p10  ;;  %s648_s25 = sshll.u32 %s185_s20, 3 }
  0x1a   : > { %s649_s26 = sshll.u32 %s1050_s18, 3  ;;  %s189_s30 = scalar_lea.vmem [#allocation2], %s648_s25 }
  0x1b   : > { %s193_s29 = scalar_lea.hbm %s1238_s0, %s649_s26  ;;  %s197_s5 = sshll.u32 %s189_s30, 4  ;;  %s198_s5 = int_to_ptr.vmem [resolvable:$true] %s197_s5 }
  0x1c   : > { %s195_s6 = sshll.u32 %s193_s29, 4  ;;  %p1166_p7 = pnand %p848_p2, %p1139_p11  ;;  %s196_s6 = int_to_ptr.hbm [resolvable:$true] %s195_s6 }
  0x1d   : > { %s186_s8 = scalar_lea.sflag [#allocation3], %s185_s20  ;;  %s950_s9 = sshra.s32 %s196_s6, 4  ;;  %s951_s9 = int_to_ptr.hbm [resolvable:$true] %s950_s9 }
  0x1e   : > { %s952_s11 = scalar_lea.hbm %s951_s9, 8  ;;  %p954_p9 = pneg %p1166_p7 }
  0x1f   : > { %p953_p8 = scmp.ne.s32.totalorder %s951_s9, %s952_s11  ;;  %s957_s26 = scalar_lea.hbm %s1238_s0, 16 }
  0x20   : > { %p958_p11 = scmp.lt.s32.totalorder %s951_s9, %s1238_s0  ;;  %p959_p0 = scmp.lt.s32.totalorder %s957_s26, %s952_s11 }
  0x21   : > { %p955_p10 = pnand %p954_p9, %p953_p8 }
  0x22   : > { %p960_p2 = por %p959_p0, %p958_p11 }
  0x23   : > { %p956_p13 = pneg %p955_p10 }
  0x25   : > { %p961_p5 = pnand %p960_p2, %p956_p13 }
  0x27   : > { %964 = shalt.err (!%p961_p5)
}
  0x28   : > { %841 = dma.hbm_to_vmem [thread:$0]  (!%p1166_p7), %s196_s6, 128, %s198_s5, %s186_s8  }
  0x29   : > { %206 = sbr.rel (%p1112_p3) target bundleno = 356 (0x164), region = 36  ;;  %s1183_s20 = sand.u32 (!%p1112_p3), 1, %s1042_s16  }
  0x2a   : > { %s651_s28 = sshll.u32 (!%p1112_p3), %s1183_s20, 3  ;;  %s209_s29 = scalar_lea.sflag (!%p1112_p3), [#allocation3], %s1183_s20 }
  0x2b   : > { %s1189_s30 = scalar_lea.vmem (!%p1112_p3), [#allocation2], %s651_s28 }
  0x2e   : > { %1025 = dma.done.wait (%p1145_p12), %s209_s29, 128  }
  0x2f   : > { %1027 = vsyncadd (%p1145_p12), %s209_s29, 4294967168 }
  0x30   : > { %1029 = dma.done.wait (%p42_p1), [#allocation6], 4096  }
  0x31   : > { %1031 = vsyncadd (%p42_p1), [#allocation6], 4294963200  ;;  %v713_v0 = vld [vmem:[#allocation5 + $0x70] sm:$0xf]  ;;  %v802_v1 = vld [vmem:[#allocation5 + $0x74] sm:$0xf0] }
  0x32   : > { %v801_v2 = vld [vmem:[#allocation5 + $0x74] sm:$0xf]  ;;  %v714_v3 = vor.u32 %v802_v1, %v713_v0  ;;  %v715_v4 = vld [vmem:[#allocation5 + $0x78] sm:$0xf0]  ;;  %v705_v5 = vld [vmem:[#allocation5 + $0x60] sm:$0xf] }
  0x33   : > { %v800_v6 = vld [vmem:[#allocation5 + $0x64] sm:$0xf0]  ;;  %v718_v7 = vor.u32 %v801_v2, %v715_v4  ;;  %v799_v8 = vld [vmem:[#allocation5 + $0x64] sm:$0xf]  ;;  %v707_v9 = vld [vmem:[#allocation5 + $0x68] sm:$0xf0] }
  0x34   : > { %352 = vmatpush.bf16.msra.mxu0 %v714_v3  ;;  %v706_v10 = vor.u32 %v800_v6, %v705_v5  ;;  %v710_v11 = vor.u32 %v799_v8, %v707_v9  ;;  %v697_v12 = vld [vmem:[#allocation5 + $0x50] sm:$0xf]  ;;  %v798_v13 = vld [vmem:[#allocation5 + $0x54] sm:$0xf0]  ;;  %v797_v14 = vld [vmem:[#allocation5 + $0x54] sm:$0xf] }
  0x35   : > { %365 = vmatpush.bf16.msra.mxu1 %v718_v7  ;;  %v699_v15 = vld [vmem:[#allocation5 + $0x58] sm:$0xf0]  ;;  %v698_v16 = vor.u32 %v798_v13, %v697_v12  ;;  %v689_v18 = vld [vmem:[#allocation5 + $0x40] sm:$0xf]  ;;  %v796_v19 = vld [vmem:[#allocation5 + $0x44] sm:$0xf0] }
  0x36   : > { %v702_v17 = vor.u32 %v797_v14, %v699_v15  ;;  %v795_v20 = vld [vmem:[#allocation5 + $0x44] sm:$0xf]  ;;  %v691_v21 = vld [vmem:[#allocation5 + $0x48] sm:$0xf0]  ;;  %v690_v22 = vor.u32 %v796_v19, %v689_v18  ;;  %v810_v23 = vld [vmem:[#allocation7 + $0x38] sm:$0xff]  ;;  %s784_s5 = sshll.u32 %s1107_s22, 3 }
  0x37   : > { %v818_v24 = vld [vmem:[#allocation7 + $0x78] sm:$0xff]  ;;  %v694_v25 = vor.u32 %v795_v20, %v691_v21  ;;  %v681_v26 = vld [vmem:[#allocation5 + $0x30] sm:$0xf]  ;;  %v793_v28 = vld [vmem:[#allocation5 + $0x34] sm:$0xf]  ;;  %510 = vmatpush.bf16.msra.mxu2 %v810_v23  ;;  %s549_s8 = scalar_lea.hbm %s1242_s4, %s784_s5  ;;  %s247_s9 = scalar_lea.vmem [#allocation8], %s651_s28 }
  0x38   : > { %353 = vmatpush.bf16.msra.mxu0 %v706_v10  ;;  %v794_v27 = vld [vmem:[#allocation5 + $0x34] sm:$0xf0]  ;;  %v683_v29 = vld [vmem:[#allocation5 + $0x38] sm:$0xf0]  ;;  %523 = vmatpush.bf16.msra.mxu3 %v818_v24  ;;  %v809_v30 = vld [vmem:[#allocation7 + $0x30] sm:$0xff]  ;;  %s551_s11 = sshll.u32 %s247_s9, 4  ;;  %s552_s11 = int_to_ptr.vmem [resolvable:$true] %s551_s11 }
  0x39   : > { %366 = vmatpush.bf16.msra.mxu1 %v710_v11  ;;  %v817_v31 = vld [vmem:[#allocation7 + $0x70] sm:$0xff]  ;;  %v682_v32 = vor.u32 %v794_v27, %v681_v26  ;;  %v686_v33 = vor.u32 %v793_v28, %v683_v29  ;;  %v673_v34 = vld [vmem:[#allocation5 + $0x20] sm:$0xf]  ;;  %v792_v35 = vld [vmem:[#allocation5 + $0x24] sm:$0xf0]  ;;  %s553_s12 = sshll.u32 %s549_s8, 4  ;;  %s554_s12 = int_to_ptr.hbm [resolvable:$true] %s553_s12 }
  0x3a   : > { %v791_v36 = vld [vmem:[#allocation5 + $0x24] sm:$0xf]  ;;  %v675_v37 = vld [vmem:[#allocation5 + $0x28] sm:$0xf0]  ;;  %v674_v40 = vor.u32 %v792_v35, %v673_v34  ;;  %v665_v42 = vld [vmem:[#allocation5 + $0x10] sm:$0xf] }
  0x3b   : > { %511 = vmatpush.bf16.msra.mxu2 %v809_v30  ;;  %v808_v38 = vld [vmem:[#allocation7 + $0x28] sm:$0xff]  ;;  %v678_v41 = vor.u32 %v791_v36, %v675_v37  ;;  %v790_v43 = vld [vmem:[#allocation5 + $0x14] sm:$0xf0]  ;;  %v789_v44 = vld [vmem:[#allocation5 + $0x14] sm:$0xf]  ;;  %s539_s25 = scalar_lea.sflag [#allocation4], %s1183_s20 }
  0x3c   : > { %354 = vmatpush.bf16.msra.mxu0 %v698_v16  ;;  %524 = vmatpush.bf16.msra.mxu3 %v817_v31  ;;  %v816_v39 = vld [vmem:[#allocation7 + $0x68] sm:$0xff]  ;;  %v667_v45 = vld [vmem:[#allocation5 + $0x18] sm:$0xf0]  ;;  %v807_v46 = vld [vmem:[#allocation7 + $0x20] sm:$0xff]  ;;  %v666_v48 = vor.u32 %v790_v43, %v665_v42  ;;  %s994_s26 = sshra.s32 %s554_s12, 4  ;;  %s1000_s29 = scalar_lea.hbm %s1242_s4, 16  ;;  %s995_s26 = int_to_ptr.hbm [resolvable:$true] %s994_s26 }
  0x3d   : > { %367 = vmatpush.bf16.msra.mxu1 %v702_v17  ;;  %v815_v47 = vld [vmem:[#allocation7 + $0x60] sm:$0xff]  ;;  %v670_v49 = vor.u32 %v789_v44, %v667_v45  ;;  %v788_v51 = vld [vmem:[#allocation5 + $0x4] sm:$0xf0]  ;;  %v659_v53 = vld [vmem:[#allocation5 + $0x8] sm:$0xf0]  ;;  %s996_s22 = scalar_lea.hbm %s995_s26, 8  ;;  %p1001_p12 = scmp.lt.s32.totalorder %s995_s26, %s1242_s4 }
  0x3e   : > { %v657_v50 = vld [vmem:[#allocation5] sm:$0xf]  ;;  %v787_v52 = vld [vmem:[#allocation5 + $0x4] sm:$0xf]  ;;  %v806_v54 = vld [vmem:[#allocation7 + $0x18] sm:$0xff]  ;;  %p997_p1 = scmp.ne.s32.totalorder %s995_s26, %s996_s22  ;;  %p1002_p7 = scmp.lt.s32.totalorder %s1000_s29, %s996_s22 }
  0x3f   : > { %512 = vmatpush.bf16.msra.mxu2 %v808_v38  ;;  %v814_v55 = vld [vmem:[#allocation7 + $0x58] sm:$0xff]  ;;  %v658_v56 = vor.u32 %v788_v51, %v657_v50  ;;  %v662_v58 = vor.u32 %v787_v52, %v659_v53  ;;  %v805_v59 = vld [vmem:[#allocation7 + $0x10] sm:$0xff]  ;;  %v804_v62 = vld [vmem:[#allocation7 + $0x8] sm:$0xff] }
  0x40   : > { %355 = vmatpush.bf16.msra.mxu0 %v690_v22  ;;  %525 = vmatpush.bf16.msra.mxu3 %v816_v39  ;;  %v248_v57 = vld [vmem:[%s1189_s30] sm:$0xff]  ;;  %v812_v63 = vld [vmem:[#allocation7 + $0x48] sm:$0xff]  ;;  %v803_v0 = vld [vmem:[#allocation7] sm:$0xff]  ;;  %p998_p3 = pnand %p997_p1, %p1152_p4  ;;  %p1003_p8 = por %p1002_p7, %p1001_p12 }
  0x41   : > { %368 = vmatpush.bf16.msra.mxu1 %v694_v25  ;;  %v813_v60 = vld [vmem:[#allocation7 + $0x50] sm:$0xff]  ;;  %v249_v61 = vpack.c.bf16 %v248_v57, %v248_v57  ;;  %v811_v1 = vld [vmem:[#allocation7 + $0x40] sm:$0xff] }
  0x42   : > { %v266_v2 = vld [vmem:[%s1241_s3] sm:$0x3]  ;;  %p999_p5 = pneg %p998_p3 }
  0x43   : > { %513 = vmatpush.bf16.msra.mxu2 %v807_v46  ;;  %v268_v3 = vperm.slane %v266_v2, 0  ;;  %v269_v4 = vperm.slane %v266_v2, 1 }
  0x44   : > { %356 = vmatpush.bf16.msra.mxu0 %v682_v32  ;;  %526 = vmatpush.bf16.msra.mxu3 %v815_v47  ;;  %p1004_p9 = pnand %p1003_p8, %p999_p5 }
  0x45   : > { %369 = vmatpush.bf16.msra.mxu1 %v686_v33 }
  0x47   : > { %514 = vmatpush.bf16.msra.mxu2 %v806_v54 }
  0x48   : > { %357 = vmatpush.bf16.msra.mxu0 %v674_v40  ;;  %527 = vmatpush.bf16.msra.mxu3 %v814_v55 }
  0x49   : > { %370 = vmatpush.bf16.msra.mxu1 %v678_v41 }
  0x4b   : > { %515 = vmatpush.bf16.msra.mxu2 %v805_v59 }
  0x4c   : > { %358 = vmatpush.bf16.msra.mxu0 %v666_v48  ;;  %528 = vmatpush.bf16.msra.mxu3 %v813_v60 }
  0x4d   : > { %371 = vmatpush.bf16.msra.mxu1 %v670_v49 }
  0x4f   : > { %516 = vmatpush.bf16.msra.mxu2 %v804_v62 }
  0x50   : > { %359 = vmatpush.bf16.msra.mxu0 %v658_v56  ;;  %529 = vmatpush.bf16.msra.mxu3 %v812_v63 }
  0x51   : > { %372 = vmatpush.bf16.msra.mxu1 %v662_v58 }
  0x53   : > { %360 = vmatmul.bf16.vlgmr.msra.gmra.mxu0 %v249_v61  ;;  %517 = vmatpush.bf16.msra.mxu2 %v803_v0 }
  0x54   : > { %373 = vmatmul.bf16.vlgmr.msra.gmra.mxu1 %v249_v61  ;;  %530 = vmatpush.bf16.msra.mxu3 %v811_v1 }
  0xd0   : > { %v361_v5 = vpop.f32.mrf.mxu0 }
  0xd1   : > { %v362_v6 = vadd.f32 %v361_v5, %v268_v3  ;;  %v374_v7 = vpop.f32.mrf.mxu1 }
  0xd2   : > { %v375_v8 = vadd.f32 %v374_v7, %v269_v4 }
  0xd3   : > { %v378_v9 = vmax.f32 %v362_v6, 0.0 }
  0xd4   : > { %v379_v10 = vmax.f32 %v375_v8, 0.0 }
  0xd5   : > { %v380_v11 = vpack.c.bf16 %v378_v9, %v378_v9 }
  0xd6   : > { %v381_v12 = vpack.c.bf16 %v379_v10, %v379_v10 }
  0xd7   : > { %518 = vmatmul.bf16.vlgmr.msra.gmra.mxu2 %v380_v11 }
  0xd8   : > { %531 = vmatmul.bf16.vlgmr.msra.gmra.mxu3 %v381_v12  ;;  %v363_v13 = vpop.f32.mrf.mxu0 }
  0xd9   : > { %v376_v14 = vpop.f32.mrf.mxu1 }
 0x15a   : > { %v519_v15 = vpop.f32.mrf.mxu2 }
 0x15b   : > { %v532_v16 = vpop.f32.mrf.mxu3 }
 0x15c   : > { %v533_v17 = vadd.f32 %v532_v16, %v519_v15 }
 0x15e   : > { %v536_v18 = vsub.f32 %v248_v57, %v533_v17 }
 0x160   : > { %537 = vst [vmem:[%s247_s9] sm:$0xff] %v536_v18 }
 0x161   : > { %1007 = shalt.err (!%p1004_p9)
}
 0x162   : > { %829 = dma.vmem_to_hbm [thread:$0]  (%p1152_p4), %s552_s11, 128, %s554_s12, %s539_s25   ;;  %v521_v19 = vpop.f32.mrf.mxu2 }
 0x163   : > { %v534_v20 = vpop.f32.mrf.mxu3 }
 0x164 PF: > { %s565_s20 = sand.u32 1, %s1038_s15   ;;  %p1249_p10 = scmp.ge.s32.totalorder %s1050_s18, 2 }
 0x165   : > { %s566_s23 = scalar_lea.sflag [#allocation4], %s565_s20 }
 0x166   : > { %p843_p13 = pnand %p1249_p10, %p1156_p6 }
 0x168   : > { %p844_p11 = pneg %p843_p13 }
 0x16a   : > { %1033 = dma.done.wait (%p844_p11), %s566_s23, 128  }
 0x16b   : > { %1035 = vsyncadd (%p844_p11), %s566_s23, 4294967168  ;;  %p18_p4 = scmp.ge.s32.totalorder %s1126_s10, 4   ;;  %s1250_s15 = smov %s1042_s16 }
 0x16c   : > { %s1251_s16 = smov %s1046_s17  ;;  %s1252_s17 = smov %s1137_s13 }
 0x16d   : > { %s1253_s18 = smov %s1126_s10  ;;  %20 = sbr.rel (!%p18_p4) target bundleno = 6 (0x6), region = 89 }
 0x172   :  { %572 = vsyncpa [#allocation3], 1 }
 0x173   :  { %574 = vsyncpa [#allocation3 + $0x1], 1 }
 0x174   :  { %575 = vsyncpa [#allocation6], 1 }
 0x175   :  { %576 = vsyncpa [#allocation4], 1 }
 0x176   :  { %578 = vsyncpa [#allocation4 + $0x1], 1 }

</bundles_post_ra>
